<compile_context>
chip_gen: v5e
topology: v5e:2x2
jax: 0.10.0
libtpu: 0.0.40
codegen_flags: <defaults>
</compile_context>

<pallas_src>
import jax
import jax.numpy as jnp
from jax.experimental import pallas as pl
from jax.experimental.pallas import tpu as pltpu


def _round_up(x, m):
    return (x + m - 1) // m * m


def _ffn_kernel(x_ref, w1_ref, b1_ref, w2_ref, b2_ref, o_ref, acc_ref):
    # x_ref:  (tm, dm_p)      row tile of flattened input
    # w1_ref: (dm_p, tf)      d_ff-slice of W1
    # b1_ref: (1, tf)         d_ff-slice of b1
    # w2_ref: (tf, dm_p)      d_ff-slice of W2
    # b2_ref: (1, dm_p)       full b2
    # o_ref:  (tm, dm_p)      output row tile (resident across the d_ff axis)
    # acc_ref:(tm, dm_p) f32  accumulator scratch
    kf = pl.program_id(1)

    # Fold b2 into the accumulator init (saves an epilogue add/RMW).
    @pl.when(kf == 0)
    def _():
        acc_ref[...] = jnp.broadcast_to(
            b2_ref[...].astype(jnp.float32), acc_ref.shape)

    h = jnp.dot(x_ref[...], w1_ref[...], preferred_element_type=jnp.float32)
    h = jnp.maximum(h + b1_ref[...], 0.0)          # ReLU (f32)
    # dropout == identity (eval mode)
    acc_ref[...] += jnp.dot(h.astype(w2_ref.dtype), w2_ref[...],
                            preferred_element_type=jnp.float32)

    @pl.when(kf == pl.num_programs(1) - 1)
    def _():
        o_ref[...] = acc_ref[...].astype(o_ref.dtype)


def positionwise_feed_forward(x, w1, b1, w2, b2, *, tm_max=256, tf_max=512):
    """x: (B, S, d_model); w1: (d_model, d_ff); b1: (d_ff,);
       w2: (d_ff, d_model); b2: (d_model,).  Weights stored as (in, out)."""
    B, S, d_model = x.shape
    d_ff = w1.shape[1]
    rows = B * S

    # Padded / tiled dimensions (keep blocks (8,128)-aligned and lane-dense).
    dm_p = _round_up(d_model, 128)
    tm = min(tm_max, _round_up(rows, 8))
    rows_p = _round_up(rows, tm)
    tf = min(tf_max, _round_up(d_ff, 128))
    dff_p = _round_up(d_ff, tf)

    # Zero-pad inputs/weights; zero padding keeps the math exact on the
    # un-padded region (padded d_ff columns of W1/rows of W2 contribute 0,
    # padded d_model columns are sliced off, padded rows are sliced off).
    x2 = jnp.pad(x.reshape(rows, d_model),
                 ((0, rows_p - rows), (0, dm_p - d_model)))
    w1_p = jnp.pad(w1, ((0, dm_p - d_model), (0, dff_p - d_ff)))
    b1_p = jnp.pad(b1, (0, dff_p - d_ff)).reshape(1, dff_p)
    w2_p = jnp.pad(w2, ((0, dff_p - d_ff), (0, dm_p - d_model)))
    b2_p = jnp.pad(b2, (0, dm_p - d_model)).reshape(1, dm_p)

    grid = (rows_p // tm, dff_p // tf)

    itemsize = jnp.dtype(x.dtype).itemsize
    w_itemsize = jnp.dtype(w1.dtype).itemsize
    cost = pl.CostEstimate(
        flops=4 * rows * d_model * d_ff,
        transcendentals=0,
        bytes_accessed=(rows * d_model * itemsize * 2          # x + out
                        + 2 * d_model * d_ff * w_itemsize      # W1 + W2
                        + (d_ff + d_model) * w_itemsize),      # biases
    )

    out = pl.pallas_call(
        _ffn_kernel,
        out_shape=jax.ShapeDtypeStruct((rows_p, dm_p), x.dtype),
        grid_spec=pltpu.PrefetchScalarGridSpec(
            num_scalar_prefetch=0,
            grid=grid,
            in_specs=[
                pl.BlockSpec((tm, dm_p), lambda i, k: (i, 0)),   # x row tile
                pl.BlockSpec((dm_p, tf), lambda i, k: (0, k)),   # W1 d_ff slice
                pl.BlockSpec((1, tf), lambda i, k: (0, k)),      # b1 d_ff slice
                pl.BlockSpec((tf, dm_p), lambda i, k: (k, 0)),   # W2 d_ff slice
                pl.BlockSpec((1, dm_p), lambda i, k: (0, 0)),    # b2 (full)
            ],
            out_specs=pl.BlockSpec((tm, dm_p), lambda i, k: (i, 0)),
            scratch_shapes=[pltpu.VMEM((tm, dm_p), jnp.float32)],
        ),
        compiler_params=pltpu.CompilerParams(
            dimension_semantics=("parallel", "arbitrary"),
            vmem_limit_bytes=48 * 1024 * 1024,
        ),
        cost_estimate=cost,
    )(x2, w1_p, b1_p, w2_p, b2_p)

    return out[:rows, :d_model].reshape(B, S, d_model)


if __name__ == "__main__":
    key = jax.random.PRNGKey(0)
    B, S, d_model, d_ff = 2, 8, 32, 64

    k_x, k_w1, k_b1, k_w2, k_b2 = jax.random.split(key, 5)
    x = jax.random.normal(k_x, (B, S, d_model), dtype=jnp.float32)

    # PyTorch nn.Linear default init: U(-1/sqrt(fan_in), 1/sqrt(fan_in)).
    # nn.Linear weight is (out, in); we store the transposed (in, out) layout.
    lim1 = 1.0 / (d_model ** 0.5)
    w1 = jax.random.uniform(k_w1, (d_model, d_ff), jnp.float32, -lim1, lim1)
    b1 = jax.random.uniform(k_b1, (d_ff,), jnp.float32, -lim1, lim1)
    lim2 = 1.0 / (d_ff ** 0.5)
    w2 = jax.random.uniform(k_w2, (d_ff, d_model), jnp.float32, -lim2, lim2)
    b2 = jax.random.uniform(k_b2, (d_model,), jnp.float32, -lim2, lim2)

    y = positionwise_feed_forward(x, w1, b1, w2, b2)
    y = jax.block_until_ready(y)

    # Pure-JAX reference check (dropout == identity in eval mode).
    ref = jnp.maximum(x @ w1 + b1, 0.0) @ w2 + b2
    assert y.shape == (B, S, d_model)
    assert jnp.allclose(y, ref, atol=1e-5, rtol=1e-5)

    print("KERNEL_OK")
</pallas_src>

<mosaic_0001>
module attributes {stable_mosaic.version = 11 : i64} {
  func.func @_ffn_kernel(%arg0: i32, %arg1: i32, %arg2: memref<16x128xf32, #tpu.memory_space<vmem>>, %arg3: memref<128x128xf32, #tpu.memory_space<vmem>>, %arg4: memref<1x128xf32, #tpu.memory_space<vmem>>, %arg5: memref<128x128xf32, #tpu.memory_space<vmem>>, %arg6: memref<1x128xf32, #tpu.memory_space<vmem>>, %arg7: memref<16x128xf32, #tpu.memory_space<vmem>>, %arg8: memref<16x128xf32, #tpu.memory_space<vmem>>) attributes {dimension_semantics = [#tpu.dimension_semantics<parallel>, #tpu.dimension_semantics<arbitrary>], iteration_bounds = array<i64: 1, 1>, scalar_prefetch = 0 : i64, scratch_operands = 1 : i64, tpu.core_type = #tpu.core_type<tc>, window_params = [{transform_indices = @transform_0, window_bounds = array<i64: 16, 128>}, {transform_indices = @transform_1, window_bounds = array<i64: 128, 128>}, {transform_indices = @transform_2, window_bounds = array<i64: 1, 128>}, {transform_indices = @transform_3, window_bounds = array<i64: 128, 128>}, {pipeline_mode = #tpu.pipeline_mode<synchronous>, transform_indices = @transform_4, window_bounds = array<i64: 1, 128>}, {transform_indices = @transform_5, window_bounds = array<i64: 16, 128>}]} {
    %c0_i32 = arith.constant 0 : i32
    %0 = arith.cmpi eq, %arg1, %c0_i32 : i32
    %1 = arith.extui %0 : i1 to i32
    %c0_i32_0 = arith.constant 0 : i32
    %2 = arith.cmpi ne, %1, %c0_i32_0 : i32
    scf.if %2 {
      %c0_16 = arith.constant 0 : index
      %c0_17 = arith.constant 0 : index
      %19 = vector.load %arg6[%c0_16, %c0_17] : memref<1x128xf32, #tpu.memory_space<vmem>>, vector<1x128xf32>
      %20 = vector.shape_cast %19 : vector<1x128xf32> to vector<1x128xf32>
      %21 = vector.broadcast %20 : vector<1x128xf32> to vector<16x128xf32>
      %c0_18 = arith.constant 0 : index
      %c0_19 = arith.constant 0 : index
      %22 = vector.load %arg8[%c0_18, %c0_19] : memref<16x128xf32, #tpu.memory_space<vmem>>, vector<16x128xf32>
      tpu.vector_store %arg8[%c0_18, %c0_19], %21 {strides = array<i32>} : memref<16x128xf32, #tpu.memory_space<vmem>>, vector<16x128xf32>,
    } else {
    }
    %c0 = arith.constant 0 : index
    %c0_1 = arith.constant 0 : index
    %3 = vector.load %arg2[%c0, %c0_1] : memref<16x128xf32, #tpu.memory_space<vmem>>, vector<16x128xf32>
    %c0_2 = arith.constant 0 : index
    %c0_3 = arith.constant 0 : index
    %4 = vector.load %arg3[%c0_2, %c0_3] : memref<128x128xf32, #tpu.memory_space<vmem>>, vector<128x128xf32>
    %cst = arith.constant dense<0.000000e+00> : vector<16x128xf32>
    %5 = tpu.matmul %3, %4, %cst {dimension_numbers = #tpu.dot_dimension_numbers<[1], [0], [0], [1], [0, 0, 1, 1], [], []>} : vector<16x128xf32>, vector<128x128xf32>, vector<16x128xf32> -> vector<16x128xf32>
    %c0_4 = arith.constant 0 : index
    %c0_5 = arith.constant 0 : index
    %6 = vector.load %arg4[%c0_4, %c0_5] : memref<1x128xf32, #tpu.memory_space<vmem>>, vector<1x128xf32>
    %7 = vector.broadcast %6 : vector<1x128xf32> to vector<16x128xf32>
    %8 = arith.addf %5, %7 : vector<16x128xf32>
    %cst_6 = arith.constant 0.000000e+00 : f32
    %9 = vector.broadcast %cst_6 : f32 to vector<16x128xf32>
    %10 = arith.maximumf %8, %9 : vector<16x128xf32>
    %c0_7 = arith.constant 0 : index
    %c0_8 = arith.constant 0 : index
    %11 = vector.load %arg8[%c0_7, %c0_8] : memref<16x128xf32, #tpu.memory_space<vmem>>, vector<16x128xf32>
    %c0_9 = arith.constant 0 : index
    %c0_10 = arith.constant 0 : index
    %12 = vector.load %arg5[%c0_9, %c0_10] : memref<128x128xf32, #tpu.memory_space<vmem>>, vector<128x128xf32>
    %cst_11 = arith.constant dense<0.000000e+00> : vector<16x128xf32>
    %13 = tpu.matmul %10, %12, %cst_11 {dimension_numbers = #tpu.dot_dimension_numbers<[1], [0], [0], [1], [0, 0, 1, 1], [], []>} : vector<16x128xf32>, vector<128x128xf32>, vector<16x128xf32> -> vector<16x128xf32>
    %14 = arith.addf %11, %13 : vector<16x128xf32>
    %c0_12 = arith.constant 0 : index
    %c0_13 = arith.constant 0 : index
    %15 = vector.load %arg8[%c0_12, %c0_13] : memref<16x128xf32, #tpu.memory_space<vmem>>, vector<16x128xf32>
    tpu.vector_store %arg8[%c0_12, %c0_13], %14 {strides = array<i32>} : memref<16x128xf32, #tpu.memory_space<vmem>>, vector<16x128xf32>,
    %c0_i32_14 = arith.constant 0 : i32
    %16 = arith.cmpi eq, %arg1, %c0_i32_14 : i32
    %17 = arith.extui %16 : i1 to i32
    %c0_i32_15 = arith.constant 0 : i32
    %18 = arith.cmpi ne, %17, %c0_i32_15 : i32
    scf.if %18 {
      %c0_16 = arith.constant 0 : index
      %c0_17 = arith.constant 0 : index
      %19 = vector.load %arg8[%c0_16, %c0_17] : memref<16x128xf32, #tpu.memory_space<vmem>>, vector<16x128xf32>
      %c0_18 = arith.constant 0 : index
      %c0_19 = arith.constant 0 : index
      %20 = vector.load %arg7[%c0_18, %c0_19] : memref<16x128xf32, #tpu.memory_space<vmem>>, vector<16x128xf32>
      tpu.vector_store %arg7[%c0_18, %c0_19], %19 {strides = array<i32>} : memref<16x128xf32, #tpu.memory_space<vmem>>, vector<16x128xf32>,
    } else {
    }
    return
  }
  func.func @transform_0(%arg0: i32, %arg1: i32) -> (i32, i32) {
    %c0_i32 = arith.constant 0 : i32
    %c0_i32_0 = arith.constant 0 : i32
    return %arg0, %c0_i32 : i32, i32
  }
  func.func @transform_1(%arg0: i32, %arg1: i32) -> (i32, i32) {
    %c0_i32 = arith.constant 0 : i32
    %c0_i32_0 = arith.constant 0 : i32
    return %c0_i32, %arg1 : i32, i32
  }
  func.func @transform_2(%arg0: i32, %arg1: i32) -> (i32, i32) {
    %c0_i32 = arith.constant 0 : i32
    %c0_i32_0 = arith.constant 0 : i32
    return %c0_i32, %arg1 : i32, i32
  }
  func.func @transform_3(%arg0: i32, %arg1: i32) -> (i32, i32) {
    %c0_i32 = arith.constant 0 : i32
    %c0_i32_0 = arith.constant 0 : i32
    return %arg1, %c0_i32 : i32, i32
  }
  func.func @transform_4(%arg0: i32, %arg1: i32) -> (i32, i32) {
    %c0_i32 = arith.constant 0 : i32
    %c0_i32_0 = arith.constant 0 : i32
    %c0_i32_1 = arith.constant 0 : i32
    return %c0_i32, %c0_i32_0 : i32, i32
  }
  func.func @transform_5(%arg0: i32, %arg1: i32) -> (i32, i32) {
    %c0_i32 = arith.constant 0 : i32
    %c0_i32_0 = arith.constant 0 : i32
    return %arg0, %c0_i32 : i32, i32
  }
}

</mosaic_0001>

<bundles_post_ra>
// kernel: tpu_custom_call.1
= control target key start
LH: loop header
LB: loop body
LE: loop exit
PB: predicated region body
PF: predicated region fallthrough
CT: control target
= control target key end

     0   :  { %10 = vsyncpa [#allocation4], 0  ;;  %s405_s0 = inlined_call_operand.hbm [shape: f32[16,128], index: 0, kind: input, shape index: {}]   ;;  %s406_s1 = inlined_call_operand.hbm [shape: f32[128,128], index: 1, kind: input, shape index: {}]   ;;  %s407_s2 = inlined_call_operand.vmem [shape: f32[1,128], index: 2, kind: input, shape index: {}]   ;;  %s408_s3 = inlined_call_operand.hbm [shape: f32[128,128], index: 3, kind: input, shape index: {}]   ;;  %s409_s4 = inlined_call_operand.vmem [shape: f32[1,128], index: 4, kind: input, shape index: {}]   ;;  %s410_s5 = inlined_call_operand.hbm [shape: f32[16,128], index: 5, kind: output, shape index: {}]  }
   0x1   :  { %11 = vsyncpa [#allocation7], 0 }
   0x2   :  { %12 = vsyncpa [#allocation5], 0  ;;  %s30_s20 = sshll.u32 %s406_s1, 4  ;;  %s339_s21 = smov [#allocation6]   ;;  %s31_s20 = int_to_ptr.hbm [resolvable:$true] %s30_s20 }
   0x3   :  { %s32_s22 = sshll.u32 %s339_s21, 4  ;;  %s17_s25 = sshll.u32 %s405_s0, 4  ;;  %s33_s22 = int_to_ptr.vmem [resolvable:$true] %s32_s22  ;;  %s18_s25 = int_to_ptr.hbm [resolvable:$true] %s17_s25 }
   0x4   :  { %s340_s26 = smov 128   ;;  %s341_s27 = smov 8  }
   0x5   :  { %38 = dma.hbm_to_vmem [thread:$0]  %s31_s20, 2048, %s33_s22, [#allocation7], %s340_s26, %s340_s26, %s341_s27  }
   0x6   :  { %s342_s28 = smov [#allocation3]   ;;  %s45_s1 = sshll.u32 %s408_s3, 4  ;;  %s46_s1 = int_to_ptr.hbm [resolvable:$true] %s45_s1 }
   0x7   :  { %s19_s29 = sshll.u32 %s342_s28, 4  ;;  %s343_s0 = smov [#allocation8]   ;;  %s20_s29 = int_to_ptr.vmem [resolvable:$true] %s19_s29 }
   0x8   :  { %25 = dma.hbm_to_vmem [thread:$0]  %s18_s25, 256, %s20_s29, [#allocation4], %s340_s26, %s340_s26, %s341_s27  }
   0x9   :  { %s47_s7 = sshll.u32 %s343_s0, 4  ;;  %s48_s7 = int_to_ptr.vmem [resolvable:$true] %s47_s7 }
   0xa   :  { %53 = dma.hbm_to_vmem [thread:$0]  %s46_s1, 2048, %s48_s7, [#allocation7], %s340_s26, %s340_s26, %s341_s27  }
   0xb   :  { %333 = dma.done.wait [#allocation4], 256  }
   0xc   :  { %334 = vsyncadd [#allocation4], 4294967040 }
   0xd   :  { %335 = dma.done.wait [#allocation7], 4096  }
   0xe   :  { %336 = vsyncadd [#allocation7], 4294963200  ;;  %v95_v0 = vld [vmem:[#allocation6 + $0x78] sm:$0xff]  ;;  %v94_v1 = vld [vmem:[#allocation6 + $0x70] sm:$0xff]  ;;  %s344_s11 = smov [#allocation9]  }
   0xf   :  { %197 = vmatpush.msra.mxu2 %v95_v0  ;;  %100 = vmatpush.msra.mxu0 %v95_v0  ;;  %v93_v2 = vld [vmem:[#allocation6 + $0x68] sm:$0xff]  ;;  %v92_v3 = vld [vmem:[#allocation6 + $0x60] sm:$0xff]  ;;  %v91_v4 = vld [vmem:[#allocation6 + $0x58] sm:$0xff]  ;;  %s181_s12 = sshll.u32 %s344_s11, 4  ;;  %s182_s12 = int_to_ptr.vmem [resolvable:$true] %s181_s12 }
  0x10   :  { %v142_v5 = vld [vmem:[#allocation8 + $0x78] sm:$0xff]  ;;  %v141_v6 = vld [vmem:[#allocation8 + $0x70] sm:$0xff]  ;;  %v140_v8 = vld [vmem:[#allocation8 + $0x68] sm:$0xff] }
  0x11   :  { %198 = vmatpush.msra.mxu2 %v94_v1  ;;  %101 = vmatpush.msra.mxu0 %v94_v1  ;;  %v90_v7 = vld [vmem:[#allocation6 + $0x50] sm:$0xff]  ;;  %v89_v9 = vld [vmem:[#allocation6 + $0x48] sm:$0xff]  ;;  %v139_v10 = vld [vmem:[#allocation8 + $0x60] sm:$0xff] }
  0x12   :  { %213 = vmatpush.msra.mxu3 %v142_v5  ;;  %143 = vmatpush.msra.mxu1 %v142_v5  ;;  %v88_v11 = vld [vmem:[#allocation6 + $0x40] sm:$0xff]  ;;  %v138_v12 = vld [vmem:[#allocation8 + $0x58] sm:$0xff]  ;;  %v137_v14 = vld [vmem:[#allocation8 + $0x50] sm:$0xff] }
  0x13   :  { %199 = vmatpush.msra.mxu2 %v93_v2  ;;  %102 = vmatpush.msra.mxu0 %v93_v2  ;;  %v87_v13 = vld [vmem:[#allocation6 + $0x38] sm:$0xff]  ;;  %v86_v15 = vld [vmem:[#allocation6 + $0x30] sm:$0xff]  ;;  %v136_v16 = vld [vmem:[#allocation8 + $0x48] sm:$0xff] }
  0x14   :  { %214 = vmatpush.msra.mxu3 %v141_v6  ;;  %144 = vmatpush.msra.mxu1 %v141_v6  ;;  %v85_v17 = vld [vmem:[#allocation6 + $0x28] sm:$0xff]  ;;  %v135_v18 = vld [vmem:[#allocation8 + $0x40] sm:$0xff]  ;;  %v134_v20 = vld [vmem:[#allocation8 + $0x38] sm:$0xff] }
  0x15   :  { %200 = vmatpush.msra.mxu2 %v92_v3  ;;  %103 = vmatpush.msra.mxu0 %v92_v3  ;;  %v84_v19 = vld [vmem:[#allocation6 + $0x20] sm:$0xff]  ;;  %v83_v21 = vld [vmem:[#allocation6 + $0x18] sm:$0xff]  ;;  %v133_v22 = vld [vmem:[#allocation8 + $0x30] sm:$0xff] }
  0x16   :  { %215 = vmatpush.msra.mxu3 %v140_v8  ;;  %145 = vmatpush.msra.mxu1 %v140_v8  ;;  %v82_v23 = vld [vmem:[#allocation6 + $0x10] sm:$0xff]  ;;  %v132_v24 = vld [vmem:[#allocation8 + $0x28] sm:$0xff]  ;;  %v131_v26 = vld [vmem:[#allocation8 + $0x20] sm:$0xff] }
  0x17   :  { %201 = vmatpush.msra.mxu2 %v91_v4  ;;  %104 = vmatpush.msra.mxu0 %v91_v4  ;;  %v81_v25 = vld [vmem:[#allocation6 + $0x8] sm:$0xff]  ;;  %v80_v27 = vld [vmem:[#allocation6] sm:$0xff]  ;;  %v79_v28 = vld [vmem:[#allocation3 + $0x8] sm:$0xff] }
  0x18   :  { %216 = vmatpush.msra.mxu3 %v139_v10  ;;  %146 = vmatpush.msra.mxu1 %v139_v10  ;;  %v78_v29 = vld [vmem:[#allocation3] sm:$0xff]  ;;  %v130_v30 = vld [vmem:[#allocation8 + $0x18] sm:$0xff]  ;;  %v128_v32 = vld [vmem:[#allocation8 + $0x8] sm:$0xff] }
  0x19   :  { %202 = vmatpush.msra.mxu2 %v90_v7  ;;  %105 = vmatpush.msra.mxu0 %v90_v7  ;;  %v129_v31 = vld [vmem:[#allocation8 + $0x10] sm:$0xff]  ;;  %v127_v33 = vld [vmem:[#allocation8] sm:$0xff] }
  0x1a   :  { %217 = vmatpush.msra.mxu3 %v138_v12  ;;  %147 = vmatpush.msra.mxu1 %v138_v12  ;;  %v235_v34 = vld [vmem:[%s407_s2] ss:$0 sm:$0xff]  ;;  %s183_s2 = sshll.u32 %s410_s5, 4  ;;  %s184_s2 = int_to_ptr.hbm [resolvable:$true] %s183_s2 }
  0x1b   :  { %203 = vmatpush.msra.mxu2 %v89_v9  ;;  %106 = vmatpush.msra.mxu0 %v89_v9  ;;  %v236_v41 = vld [vmem:[%s409_s4] ss:$0 sm:$0xff] }
  0x1c   :  { %218 = vmatpush.msra.mxu3 %v137_v14  ;;  %148 = vmatpush.msra.mxu1 %v137_v14 }
  0x1d   :  { %204 = vmatpush.msra.mxu2 %v88_v11  ;;  %107 = vmatpush.msra.mxu0 %v88_v11 }
  0x1e   :  { %219 = vmatpush.msra.mxu3 %v136_v16  ;;  %149 = vmatpush.msra.mxu1 %v136_v16 }
  0x1f   :  { %205 = vmatpush.msra.mxu2 %v87_v13  ;;  %108 = vmatpush.msra.mxu0 %v87_v13 }
  0x20   :  { %220 = vmatpush.msra.mxu3 %v135_v18  ;;  %150 = vmatpush.msra.mxu1 %v135_v18 }
  0x21   :  { %206 = vmatpush.msra.mxu2 %v86_v15  ;;  %109 = vmatpush.msra.mxu0 %v86_v15 }
  0x22   :  { %221 = vmatpush.msra.mxu3 %v134_v20  ;;  %151 = vmatpush.msra.mxu1 %v134_v20 }
  0x23   :  { %207 = vmatpush.msra.mxu2 %v85_v17  ;;  %110 = vmatpush.msra.mxu0 %v85_v17 }
  0x24   :  { %222 = vmatpush.msra.mxu3 %v133_v22  ;;  %152 = vmatpush.msra.mxu1 %v133_v22 }
  0x25   :  { %208 = vmatpush.msra.mxu2 %v84_v19  ;;  %111 = vmatpush.msra.mxu0 %v84_v19 }
  0x26   :  { %223 = vmatpush.msra.mxu3 %v132_v24  ;;  %153 = vmatpush.msra.mxu1 %v132_v24 }
  0x27   :  { %209 = vmatpush.msra.mxu2 %v83_v21  ;;  %112 = vmatpush.msra.mxu0 %v83_v21 }
  0x28   :  { %224 = vmatpush.msra.mxu3 %v131_v26  ;;  %154 = vmatpush.msra.mxu1 %v131_v26 }
  0x29   :  { %210 = vmatpush.msra.mxu2 %v82_v23  ;;  %113 = vmatpush.msra.mxu0 %v82_v23 }
  0x2a   :  { %225 = vmatpush.msra.mxu3 %v130_v30  ;;  %155 = vmatpush.msra.mxu1 %v130_v30 }
  0x2b   :  { %211 = vmatpush.msra.mxu2 %v81_v25  ;;  %114 = vmatpush.msra.mxu0 %v81_v25 }
  0x2c   :  { %226 = vmatpush.msra.mxu3 %v129_v31  ;;  %156 = vmatpush.msra.mxu1 %v129_v31 }
  0x2d   :  { %212 = vmatpush.msra.mxu2 %v80_v27  ;;  %115 = vmatpush.msra.mxu0 %v80_v27 }
  0x2e   :  { %119 = vmatmul.f32.vlgmr.msra.gmra.mxu2 %v79_v28  ;;  %116 = vmatmul.f32.vlgmr.msra.gmra.mxu0 %v78_v29 }
  0x2f   :  { %227 = vmatpush.msra.mxu3 %v128_v32  ;;  %157 = vmatpush.msra.mxu1 %v128_v32 }
  0x31   :  { %228 = vmatpush.msra.mxu3 %v127_v33  ;;  %158 = vmatpush.msra.mxu1 %v127_v33 }
  0xab   :  { %v117_v35 = vpop.f32.mrf.mxu0 }
  0xac   :  { %v118_v36 = vadd.f32 %v235_v34, %v117_v35 }
  0xae   :  { %v123_v37 = vmax.f32 %v118_v36, 0.0 }
  0xb0   :  { %159 = vmatmul.f32.vlgmr.msra.gmra.mxu1 %v123_v37 }
  0xb1   :  { %v120_v38 = vpop.f32.mrf.mxu2 }
  0xb2   :  { %v121_v39 = vadd.f32 %v235_v34, %v120_v38 }
  0xb4   :  { %v124_v40 = vmax.f32 %v121_v39, 0.0 }
  0xb6   :  { %162 = vmatmul.f32.vlgmr.msra.gmra.mxu3 %v124_v40 }
 0x12d   :  { %v160_v42 = vpop.f32.mrf.mxu1 }
 0x12e   :  { %v166_v43 = vadd.f32 %v236_v41, %v160_v42 }
 0x130   :  { %175 = vst [vmem:[#allocation9] sm:$0xff] %v166_v43 }
 0x139   :  { %v163_v44 = vpop.f32.mrf.mxu3 }
 0x13a   :  { %v167_v45 = vadd.f32 %v236_v41, %v163_v44 }
 0x13c   :  { %176 = vst [vmem:[#allocation9 + $0x8] sm:$0xff] %v167_v45 }
 0x13d   :  { %189 = dma.vmem_to_hbm [thread:$0]  %s182_s12, 256, %s184_s2, [#allocation5], %s340_s26, %s340_s26, %s341_s27  }
 0x13e   :  { %337 = dma.done.wait [#allocation5], 256  }
 0x13f   :  { %338 = vsyncadd [#allocation5], 4294967040 }
 0x140   :  { %194 = vsyncpa [#allocation4], 1 }
 0x141   :  { %195 = vsyncpa [#allocation7], 1 }
 0x142   :  { %196 = vsyncpa [#allocation5], 1 }

</bundles_post_ra>
